<compile_context>
chip_gen: v7x
topology: tpu7x:2x2x1
jax: 0.10.0
libtpu: 0.0.40
codegen_flags: <defaults>
</compile_context>

<pallas_src>
import functools
import math

import jax
import jax.numpy as jnp
from jax.experimental import pallas as pl
from jax.experimental.pallas import tpu as pltpu

LANES = 128


def _round_up(v, m):
    return ((v + m - 1) // m) * m


def _pad2d(x, shape):
    return jnp.pad(x, ((0, shape[0] - x.shape[0]), (0, shape[1] - x.shape[1])))


def _pick_tk(fp):
    for tk in (512, 256, 128):
        if fp % tk == 0:
            return tk
    return fp


# ----------------------------------------------------------------------------
# Fused TransferNet-forward kernel.
#   grid axis k : tiles of the bottleneck contraction (feature) dimension.
#   inputs : src/tgt (N, tk) bf16 tiles, Wb (tk, Bp) bf16 tile, bb (1, Bp) f32,
#            Wc (Bp, Cp) bf16, bc/log_prior/cls_weight (1, Cp) f32,
#            labels (N, 1) int32, student/teacher target logits (N, Cp) f32.
#   outputs: emb  (N, Bp)    source bottleneck embedding (lane-dense)
#            divw (N, 128)   per-sample JSD re-weighting column (lane-dense)
#            loss (1, 128)   lane 0 = clf_loss, lane 1 = transfer_loss
# ----------------------------------------------------------------------------
def _fused_transfernet_kernel(src_ref, tgt_ref, wb_ref, bb_ref, wc_ref, bc_ref,
                              logprior_ref, clsw_ref, lbl_ref, tcs_ref, tct_ref,
                              emb_ref, divw_ref, loss_ref,
                              acc_src, acc_tgt,
                              *, n_src, num_class):
    k = pl.program_id(0)

    @pl.when(k == 0)
    def _():
        acc_src[...] = jnp.zeros_like(acc_src)
        acc_tgt[...] = jnp.zeros_like(acc_tgt)

    # ---- bottleneck Linear: bf16 MXU tiles, f32 accumulation over the K grid
    wb = wb_ref[...]
    acc_src[...] += jnp.dot(src_ref[...], wb, preferred_element_type=jnp.float32)
    acc_tgt[...] += jnp.dot(tgt_ref[...], wb, preferred_element_type=jnp.float32)

    @pl.when(k == pl.num_programs(0) - 1)
    def _():
        f32 = jnp.float32
        nf = float(n_src)
        inv_nf = 1.0 / nf
        neg = f32(-1e30)
        log_bal = math.log(1.0 / num_class + 1e-9)

        bb = bb_ref[...]
        hs = jnp.maximum(acc_src[...] + bb, 0.0)        # source embedding (N, Bp)
        ht = jnp.maximum(acc_tgt[...] + bb, 0.0)        # target embedding (N, Bp)
        emb_ref[...] = hs                               # lane-dense store

        # ---- classifier Linear on the source embedding (bf16 MXU, f32 acc)
        logits = jnp.dot(hs.astype(jnp.bfloat16), wc_ref[...],
                         preferred_element_type=jnp.float32) + bc_ref[...]  # (N, Cp)

        cp = logits.shape[1]
        cmask = jax.lax.broadcasted_iota(jnp.int32, (1, cp), 1) < num_class
        col = jax.lax.broadcasted_iota(jnp.int32, (n_src, cp), 1)
        onehot = (col == lbl_ref[...]).astype(f32)      # in-kernel one-hot

        log_prior = logprior_ref[...]
        clsw = clsw_ref[...]

        # ---- LADELoss (remine lower bound, remine_lambda = 0.1)
        per_cls_sum = jnp.sum(logits * onehot, axis=0, keepdims=True)   # (1, Cp)
        num_per_cls = jnp.sum(onehot, axis=0, keepdims=True)            # (1, Cp)
        spread = logits - log_prior + log_bal
        mx = jnp.max(spread, axis=0, keepdims=True)
        lse = jnp.log(jnp.sum(jnp.exp(spread - mx), axis=0, keepdims=True)) + mx
        first = per_cls_sum * pl.reciprocal(num_per_cls + 1e-8, approx=True)
        second = lse - math.log(nf)
        estim = (first - second) - (second * second) * 0.1
        lade = -jnp.sum(jnp.where(cmask, estim * clsw, 0.0),
                        axis=1, keepdims=True)                          # (1, 1)

        # ---- PriorCELoss (CE on prior-adjusted logits, mean over batch)
        logits_m = jnp.where(cmask, logits, neg)        # mask padded classes
        adj = logits_m + log_prior
        amx = jnp.max(adj, axis=1, keepdims=True)
        za = adj - amx
        logp = za - jnp.log(jnp.sum(jnp.exp(za), axis=1, keepdims=True))
        ce = jnp.sum(onehot * (-logp), keepdims=True) * inv_nf          # (1, 1)

        clf_loss = lade * 0.1 + ce                                      # (1, 1)

        # ---- transfer loss: linear-kernel MMD between mean embeddings
        d = (jnp.sum(hs, axis=0, keepdims=True)
             - jnp.sum(ht, axis=0, keepdims=True)) * inv_nf             # (1, Bp)
        mmd = jnp.sum(d * d, axis=1, keepdims=True)                     # (1, 1)

        # ---- JSD per-sample divergence + re-weighting
        tcs = jnp.where(cmask, tcs_ref[...], neg)
        tct = jnp.where(cmask, tct_ref[...], neg)

        # student: softmax probs fused into its log-softmax (single exp pass)
        ms = jnp.max(tcs, axis=1, keepdims=True)
        zs = tcs - ms
        es = jnp.exp(zs)
        ss = jnp.sum(es, axis=1, keepdims=True)
        log_p = zs - jnp.log(ss)
        p = es * pl.reciprocal(ss, approx=True)
        # teacher: only the log-softmax is needed
        mt = jnp.max(tct, axis=1, keepdims=True)
        zt = tct - mt
        log_q = zt - jnp.log(jnp.sum(jnp.exp(zt), axis=1, keepdims=True))

        # total_m == softmax(student) exactly (PyTorch averages net_1_probs with
        # itself), so the first KL term is identically zero.
        kl = jnp.where(cmask, p * (log_p - log_q), 0.0)
        jsd = 0.5 * jnp.sum(kl, axis=1, keepdims=True)                  # (N, 1)

        m_div = jnp.sum(jsd, axis=0, keepdims=True) * inv_nf
        var = jnp.sum((jsd - m_div) ** 2, axis=0, keepdims=True) * (1.0 / (nf - 1.0))
        std = jnp.maximum(jnp.sqrt(var), f32(1e-12))    # guard std == 0
        inv_std = pl.reciprocal(std, approx=True)
        low = m_div - std
        high = m_div + std
        w_low = pl.reciprocal(1.0 + (low - jsd) * inv_std * 4.0, approx=True)
        w_high = 1.0 + (jsd - std - m_div) * inv_std * 4.0
        w = jnp.where(jsd < low, w_low,
                      jnp.where(jsd > high, w_high, jnp.ones_like(jsd)))
        w = jnp.clip(w, 0.1, 10.0)
        divw_ref[...] = jnp.broadcast_to(w, divw_ref.shape)             # (N, 128)

        # ---- packed scalar outputs: lane 0 = clf_loss, lane 1 = transfer_loss
        lane = jax.lax.broadcasted_iota(jnp.int32, loss_ref.shape, 1)
        loss_ref[...] = jnp.where(lane == 0, clf_loss,
                                  jnp.where(lane == 1, mmd, 0.0))


def fused_transfernet(src, tgt, wb, bb, wc, bc, log_prior, clsw, lbl, tcs, tct,
                      *, n_src, num_class, tk):
    n, fp = src.shape
    bp = wb.shape[1]
    cp = wc.shape[1]
    kt = fp // tk

    cost = pl.CostEstimate(
        flops=int(4 * n * fp * bp + 2 * n * bp * cp + 40 * n * cp),
        transcendentals=int(4 * n * cp + 16 * n),
        bytes_accessed=int(2 * n * fp * 2 + fp * bp * 2 + bp * cp * 2
                           + (bp + 3 * cp) * 4 + n * 4 + 2 * n * cp * 4
                           + n * bp * 4 + n * LANES * 4 + LANES * 4),
    )

    # conservative scoped-VMEM request: 2x (double-buffered) block bytes + scratch
    blk_bytes = (2 * n * tk * 2 + tk * bp * 2 + bp * 4 + bp * cp * 2
                 + 3 * cp * 4 + n * 4 + 2 * n * cp * 4
                 + n * bp * 4 + n * LANES * 4 + LANES * 4)
    scratch_bytes = 2 * n * bp * 4
    vmem_limit = int(min(max(2 * blk_bytes + scratch_bytes + (4 << 20), 16 << 20),
                         64 << 20))

    return pl.pallas_call(
        functools.partial(_fused_transfernet_kernel, n_src=n_src,
                          num_class=num_class),
        out_shape=(jax.ShapeDtypeStruct((n, bp), jnp.float32),      # source emb
                   jax.ShapeDtypeStruct((n, LANES), jnp.float32),   # JSD weights
                   jax.ShapeDtypeStruct((1, LANES), jnp.float32)),  # packed losses
        grid=(kt,),
        in_specs=[
            pl.BlockSpec((n, tk), lambda k: (0, k)),         # source feats (bf16)
            pl.BlockSpec((n, tk), lambda k: (0, k)),         # target feats (bf16)
            pl.BlockSpec((tk, bp), lambda k: (k, 0)),        # Wb (bf16)
            pl.BlockSpec((1, bp), lambda k: (0, 0)),         # bb
            pl.BlockSpec((bp, cp), lambda k: (0, 0)),        # Wc (bf16)
            pl.BlockSpec((1, cp), lambda k: (0, 0)),         # bc
            pl.BlockSpec((1, cp), lambda k: (0, 0)),         # log(prior + 1e-9)
            pl.BlockSpec((1, cp), lambda k: (0, 0)),         # cls_weight
            pl.BlockSpec((n, 1), lambda k: (0, 0)),          # int32 labels
            pl.BlockSpec((n, cp), lambda k: (0, 0)),         # target student logits
            pl.BlockSpec((n, cp), lambda k: (0, 0)),         # target teacher logits
        ],
        out_specs=(pl.BlockSpec((n, bp), lambda k: (0, 0)),
                   pl.BlockSpec((n, LANES), lambda k: (0, 0)),
                   pl.BlockSpec((1, LANES), lambda k: (0, 0))),
        scratch_shapes=[pltpu.VMEM((n, bp), jnp.float32),
                        pltpu.VMEM((n, bp), jnp.float32)],
        compiler_params=pltpu.CompilerParams(
            dimension_semantics=("arbitrary",),
            vmem_limit_bytes=vmem_limit),
        cost_estimate=cost,
    )(src, tgt, wb, bb, wc, bc, log_prior, clsw, lbl, tcs, tct)


# ----------------------------------------------------------------------------
# One-time parameter prep (hoisted out of the per-step forward): lane-dense
# padding, bf16 weight cast, precomputed log-prior.
# ----------------------------------------------------------------------------
def prepare_transfer_params(params, num_class):
    feat_dim, bw = params["Wb"].shape
    fp = _round_up(feat_dim, LANES)
    bp = _round_up(bw, LANES)
    cp = _round_up(num_class, LANES)
    return {
        "Wb": _pad2d(params["Wb"], (fp, bp)).astype(jnp.bfloat16),
        "bb": _pad2d(params["bb"], (1, bp)).astype(jnp.float32),
        "Wc": _pad2d(params["Wc"], (bp, cp)).astype(jnp.bfloat16),
        "bc": _pad2d(params["bc"], (1, cp)).astype(jnp.float32),
        "log_prior": _pad2d(jnp.log(params["prior"] + 1e-9),
                            (1, cp)).astype(jnp.float32),
        "cls_weight": _pad2d(params["cls_weight"], (1, cp)).astype(jnp.float32),
        "dims": (feat_dim, bw, num_class, fp, bp, cp),
    }


# ----------------------------------------------------------------------------
# TransferNet.forward wrapper.
# ----------------------------------------------------------------------------
def transfer_net_forward(kparams, source_feat, target_feat, source_label,
                         target_clf_student, target_clf_teach, lamb, startup):
    feat_dim, bw, num_class, fp, bp, cp = kparams["dims"]
    n = source_feat.shape[0]
    # NOTE: keep n a multiple of 8 (ideally 16 for bf16 feature packing) so every
    # tile stays (sublane, 128)-aligned at production sizes.
    tk = _pick_tk(fp)

    src = _pad2d(source_feat.astype(jnp.bfloat16), (n, fp))
    tgt = _pad2d(target_feat.astype(jnp.bfloat16), (n, fp))
    lbl = source_label.astype(jnp.int32).reshape(n, 1)
    tcs = _pad2d(target_clf_student.astype(jnp.float32), (n, cp))
    tct = _pad2d(target_clf_teach.astype(jnp.float32), (n, cp))

    emb_p, divw, losses = fused_transfernet(
        src, tgt, kparams["Wb"], kparams["bb"], kparams["Wc"], kparams["bc"],
        kparams["log_prior"], kparams["cls_weight"], lbl, tcs, tct,
        n_src=n, num_class=num_class, tk=tk)

    clf_loss = losses[0, 0]
    transfer_loss = losses[0, 1]
    source = emb_p[:, :bw]

    # JSD re-weighting of the pseudo-labels (static branch, matches PyTorch).
    # For transfer_loss == 'mmd' the rescaled logits do not affect the returns.
    if lamb > startup:
        div = jnp.broadcast_to(divw[:, :1], target_clf_student.shape)
        target_clf_student = target_clf_student / div
        target_clf_teach = target_clf_teach / div

    return clf_loss, transfer_loss, source


# ----------------------------------------------------------------------------
if __name__ == "__main__":
    key = jax.random.PRNGKey(0)
    ks = jax.random.split(key, 10)

    N = 8            # batch size (source == target batch)
    FEAT_DIM = 64    # backbone output feature dim (stand-in for resnet50's 2048)
    BW = 32          # bottleneck_width
    C = 8            # num_class

    params = {
        "Wb": 0.05 * jax.random.normal(ks[0], (FEAT_DIM, BW), jnp.float32),
        "bb": 0.01 * jax.random.normal(ks[1], (1, BW), jnp.float32),
        "Wc": 0.05 * jax.random.normal(ks[2], (BW, C), jnp.float32),
        "bc": 0.01 * jax.random.normal(ks[3], (1, C), jnp.float32),
    }
    num_per_class = jnp.arange(1, C + 1, dtype=jnp.float32) * 10.0
    prior = (num_per_class / num_per_class.sum()).reshape(1, C)
    params["prior"] = prior
    params["cls_weight"] = prior   # cls_weight == img_num_per_cls / sum == prior

    kparams = prepare_transfer_params(params, num_class=C)   # one-time prep

    source_feat = jax.random.normal(ks[4], (N, FEAT_DIM), jnp.float32)
    target_feat = jax.random.normal(ks[5], (N, FEAT_DIM), jnp.float32)
    source_label = jax.random.randint(ks[6], (N,), 0, C)
    target_clf_student = jax.random.normal(ks[7], (N, C), jnp.float32)
    target_clf_teach = jax.random.normal(ks[8], (N, C), jnp.float32)

    lamb, startup = 1.0, 0.5   # lamb > startup exercises the div-rescaling branch

    clf_loss, transfer_loss, source_emb = transfer_net_forward(
        kparams, source_feat, target_feat, source_label,
        target_clf_student, target_clf_teach, lamb, startup)

    jax.block_until_ready((clf_loss, transfer_loss, source_emb))
    assert source_emb.shape == (N, BW)
    assert jnp.isfinite(clf_loss) and jnp.isfinite(transfer_loss)
    print("KERNEL_OK")
</pallas_src>

<mosaic_0001>
module attributes {stable_mosaic.version = 11 : i64} {
  func.func @_fused_transfernet_kernel(%arg0: i32, %arg1: memref<8x128xbf16, #tpu.memory_space<vmem>>, %arg2: memref<8x128xbf16, #tpu.memory_space<vmem>>, %arg3: memref<128x128xbf16, #tpu.memory_space<vmem>>, %arg4: memref<1x128xf32, #tpu.memory_space<vmem>>, %arg5: memref<128x128xbf16, #tpu.memory_space<vmem>>, %arg6: memref<1x128xf32, #tpu.memory_space<vmem>>, %arg7: memref<1x128xf32, #tpu.memory_space<vmem>>, %arg8: memref<1x128xf32, #tpu.memory_space<vmem>>, %arg9: memref<8x1xi32, #tpu.memory_space<vmem>>, %arg10: memref<8x128xf32, #tpu.memory_space<vmem>>, %arg11: memref<8x128xf32, #tpu.memory_space<vmem>>, %arg12: memref<8x128xf32, #tpu.memory_space<vmem>>, %arg13: memref<8x128xf32, #tpu.memory_space<vmem>>, %arg14: memref<1x128xf32, #tpu.memory_space<vmem>>, %arg15: memref<8x128xf32, #tpu.memory_space<vmem>>, %arg16: memref<8x128xf32, #tpu.memory_space<vmem>>) attributes {dimension_semantics = [#tpu.dimension_semantics<arbitrary>], iteration_bounds = array<i64: 1>, scalar_prefetch = 0 : i64, scratch_operands = 2 : i64, tpu.core_type = #tpu.core_type<tc>, window_params = [{transform_indices = @transform_0, window_bounds = array<i64: 8, 128>}, {transform_indices = @transform_1, window_bounds = array<i64: 8, 128>}, {transform_indices = @transform_2, window_bounds = array<i64: 128, 128>}, {pipeline_mode = #tpu.pipeline_mode<synchronous>, transform_indices = @transform_3, window_bounds = array<i64: 1, 128>}, {pipeline_mode = #tpu.pipeline_mode<synchronous>, transform_indices = @transform_4, window_bounds = array<i64: 128, 128>}, {pipeline_mode = #tpu.pipeline_mode<synchronous>, transform_indices = @transform_5, window_bounds = array<i64: 1, 128>}, {pipeline_mode = #tpu.pipeline_mode<synchronous>, transform_indices = @transform_6, window_bounds = array<i64: 1, 128>}, {pipeline_mode = #tpu.pipeline_mode<synchronous>, transform_indices = @transform_7, window_bounds = array<i64: 1, 128>}, {pipeline_mode = #tpu.pipeline_mode<synchronous>, transform_indices = @transform_8, window_bounds = array<i64: 8, 1>}, {pipeline_mode = #tpu.pipeline_mode<synchronous>, transform_indices = @transform_9, window_bounds = array<i64: 8, 128>}, {pipeline_mode = #tpu.pipeline_mode<synchronous>, transform_indices = @transform_10, window_bounds = array<i64: 8, 128>}, {pipeline_mode = #tpu.pipeline_mode<synchronous>, transform_indices = @transform_11, window_bounds = array<i64: 8, 128>}, {pipeline_mode = #tpu.pipeline_mode<synchronous>, transform_indices = @transform_12, window_bounds = array<i64: 8, 128>}, {pipeline_mode = #tpu.pipeline_mode<synchronous>, transform_indices = @transform_13, window_bounds = array<i64: 1, 128>}]} {
    %c0_i32 = arith.constant 0 : i32
    %0 = arith.cmpi eq, %arg0, %c0_i32 : i32
    %1 = arith.extui %0 : i1 to i32
    %c0_i32_0 = arith.constant 0 : i32
    %2 = arith.cmpi ne, %1, %c0_i32_0 : i32
    scf.if %2 {
      %cst_17 = arith.constant 0.000000e+00 : f32
      %17 = vector.broadcast %cst_17 : f32 to vector<8x128xf32>
      %c0_18 = arith.constant 0 : index
      %c0_19 = arith.constant 0 : index
      %18 = vector.load %arg15[%c0_18, %c0_19] : memref<8x128xf32, #tpu.memory_space<vmem>>, vector<8x128xf32>
      tpu.vector_store %arg15[%c0_18, %c0_19], %17 {strides = array<i32>} : memref<8x128xf32, #tpu.memory_space<vmem>>, vector<8x128xf32>,
      %cst_20 = arith.constant 0.000000e+00 : f32
      %19 = vector.broadcast %cst_20 : f32 to vector<8x128xf32>
      %c0_21 = arith.constant 0 : index
      %c0_22 = arith.constant 0 : index
      %20 = vector.load %arg16[%c0_21, %c0_22] : memref<8x128xf32, #tpu.memory_space<vmem>>, vector<8x128xf32>
      tpu.vector_store %arg16[%c0_21, %c0_22], %19 {strides = array<i32>} : memref<8x128xf32, #tpu.memory_space<vmem>>, vector<8x128xf32>,
    } else {
    }
    %c0 = arith.constant 0 : index
    %c0_1 = arith.constant 0 : index
    %3 = vector.load %arg3[%c0, %c0_1] : memref<128x128xbf16, #tpu.memory_space<vmem>>, vector<128x128xbf16>
    %c0_2 = arith.constant 0 : index
    %c0_3 = arith.constant 0 : index
    %4 = vector.load %arg15[%c0_2, %c0_3] : memref<8x128xf32, #tpu.memory_space<vmem>>, vector<8x128xf32>
    %c0_4 = arith.constant 0 : index
    %c0_5 = arith.constant 0 : index
    %5 = vector.load %arg1[%c0_4, %c0_5] : memref<8x128xbf16, #tpu.memory_space<vmem>>, vector<8x128xbf16>
    %cst = arith.constant dense<0.000000e+00> : vector<8x128xf32>
    %6 = tpu.matmul %5, %3, %cst {dimension_numbers = #tpu.dot_dimension_numbers<[1], [0], [0], [1], [0, 0, 1, 1], [], []>} : vector<8x128xbf16>, vector<128x128xbf16>, vector<8x128xf32> -> vector<8x128xf32>
    %7 = arith.addf %4, %6 : vector<8x128xf32>
    %c0_6 = arith.constant 0 : index
    %c0_7 = arith.constant 0 : index
    %8 = vector.load %arg15[%c0_6, %c0_7] : memref<8x128xf32, #tpu.memory_space<vmem>>, vector<8x128xf32>
    tpu.vector_store %arg15[%c0_6, %c0_7], %7 {strides = array<i32>} : memref<8x128xf32, #tpu.memory_space<vmem>>, vector<8x128xf32>,
    %c0_8 = arith.constant 0 : index
    %c0_9 = arith.constant 0 : index
    %9 = vector.load %arg16[%c0_8, %c0_9] : memref<8x128xf32, #tpu.memory_space<vmem>>, vector<8x128xf32>
    %c0_10 = arith.constant 0 : index
    %c0_11 = arith.constant 0 : index
    %10 = vector.load %arg2[%c0_10, %c0_11] : memref<8x128xbf16, #tpu.memory_space<vmem>>, vector<8x128xbf16>
    %cst_12 = arith.constant dense<0.000000e+00> : vector<8x128xf32>
    %11 = tpu.matmul %10, %3, %cst_12 {dimension_numbers = #tpu.dot_dimension_numbers<[1], [0], [0], [1], [0, 0, 1, 1], [], []>} : vector<8x128xbf16>, vector<128x128xbf16>, vector<8x128xf32> -> vector<8x128xf32>
    %12 = arith.addf %9, %11 : vector<8x128xf32>
    %c0_13 = arith.constant 0 : index
    %c0_14 = arith.constant 0 : index
    %13 = vector.load %arg16[%c0_13, %c0_14] : memref<8x128xf32, #tpu.memory_space<vmem>>, vector<8x128xf32>
    tpu.vector_store %arg16[%c0_13, %c0_14], %12 {strides = array<i32>} : memref<8x128xf32, #tpu.memory_space<vmem>>, vector<8x128xf32>,
    %c0_i32_15 = arith.constant 0 : i32
    %14 = arith.cmpi eq, %arg0, %c0_i32_15 : i32
    %15 = arith.extui %14 : i1 to i32
    %c0_i32_16 = arith.constant 0 : i32
    %16 = arith.cmpi ne, %15, %c0_i32_16 : i32
    scf.if %16 {
      %c0_17 = arith.constant 0 : index
      %c0_18 = arith.constant 0 : index
      %17 = vector.load %arg4[%c0_17, %c0_18] : memref<1x128xf32, #tpu.memory_space<vmem>>, vector<1x128xf32>
      %c0_19 = arith.constant 0 : index
      %c0_20 = arith.constant 0 : index
      %18 = vector.load %arg15[%c0_19, %c0_20] : memref<8x128xf32, #tpu.memory_space<vmem>>, vector<8x128xf32>
      %19 = vector.broadcast %17 : vector<1x128xf32> to vector<8x128xf32>
      %20 = arith.addf %18, %19 : vector<8x128xf32>
      %cst_21 = arith.constant 0.000000e+00 : f32
      %21 = vector.broadcast %cst_21 : f32 to vector<8x128xf32>
      %22 = arith.maximumf %20, %21 : vector<8x128xf32>
      %c0_22 = arith.constant 0 : index
      %c0_23 = arith.constant 0 : index
      %23 = vector.load %arg16[%c0_22, %c0_23] : memref<8x128xf32, #tpu.memory_space<vmem>>, vector<8x128xf32>
      %24 = vector.broadcast %17 : vector<1x128xf32> to vector<8x128xf32>
      %25 = arith.addf %23, %24 : vector<8x128xf32>
      %cst_24 = arith.constant 0.000000e+00 : f32
      %26 = vector.broadcast %cst_24 : f32 to vector<8x128xf32>
      %27 = arith.maximumf %25, %26 : vector<8x128xf32>
      %c0_25 = arith.constant 0 : index
      %c0_26 = arith.constant 0 : index
      %28 = vector.load %arg12[%c0_25, %c0_26] : memref<8x128xf32, #tpu.memory_space<vmem>>, vector<8x128xf32>
      tpu.vector_store %arg12[%c0_25, %c0_26], %22 {strides = array<i32>} : memref<8x128xf32, #tpu.memory_space<vmem>>, vector<8x128xf32>,
      %29 = arith.truncf %22 : vector<8x128xf32> to vector<8x128xbf16>
      %c0_27 = arith.constant 0 : index
      %c0_28 = arith.constant 0 : index
      %30 = vector.load %arg5[%c0_27, %c0_28] : memref<128x128xbf16, #tpu.memory_space<vmem>>, vector<128x128xbf16>
      %cst_29 = arith.constant dense<0.000000e+00> : vector<8x128xf32>
      %31 = tpu.matmul %29, %30, %cst_29 {dimension_numbers = #tpu.dot_dimension_numbers<[1], [0], [0], [1], [0, 0, 1, 1], [], []>} : vector<8x128xbf16>, vector<128x128xbf16>, vector<8x128xf32> -> vector<8x128xf32>
      %c0_30 = arith.constant 0 : index
      %c0_31 = arith.constant 0 : index
      %32 = vector.load %arg6[%c0_30, %c0_31] : memref<1x128xf32, #tpu.memory_space<vmem>>, vector<1x128xf32>
      %33 = vector.broadcast %32 : vector<1x128xf32> to vector<8x128xf32>
      %34 = arith.addf %31, %33 : vector<8x128xf32>
      %35 = tpu.iota {dimensions = array<i32: 1>} : vector<1x128xi32>
      %c8_i32 = arith.constant 8 : i32
      %36 = vector.broadcast %c8_i32 : i32 to vector<1x128xi32>
      %37 = arith.cmpi slt, %35, %36 : vector<1x128xi32>
      %38 = tpu.iota {dimensions = array<i32: 1>} : vector<8x128xi32>
      %c0_32 = arith.constant 0 : index
      %c0_33 = arith.constant 0 : index
      %39 = vector.load %arg9[%c0_32, %c0_33] : memref<8x1xi32, #tpu.memory_space<vmem>>, vector<8x1xi32>
      %40 = vector.broadcast %39 : vector<8x1xi32> to vector<8x128xi32>
      %41 = arith.cmpi eq, %38, %40 : vector<8x128xi32>
      %42 = arith.extui %41 : vector<8x128xi1> to vector<8x128xi32>
      %43 = arith.sitofp %42 : vector<8x128xi32> to vector<8x128xf32>
      %c0_34 = arith.constant 0 : index
      %c0_35 = arith.constant 0 : index
      %44 = vector.load %arg7[%c0_34, %c0_35] : memref<1x128xf32, #tpu.memory_space<vmem>>, vector<1x128xf32>
      %c0_36 = arith.constant 0 : index
      %c0_37 = arith.constant 0 : index
      %45 = vector.load %arg8[%c0_36, %c0_37] : memref<1x128xf32, #tpu.memory_space<vmem>>, vector<1x128xf32>
      %46 = arith.mulf %34, %43 : vector<8x128xf32>
      %cst_38 = arith.constant dense<0.000000e+00> : vector<128xf32>
      %47 = vector.multi_reduction <add>, %46, %cst_38 [0] : vector<8x128xf32> to vector<128xf32>
      %48 = vector.shape_cast %47 : vector<128xf32> to vector<1x128xf32>
      %cst_39 = arith.constant dense<0.000000e+00> : vector<128xf32>
      %49 = vector.multi_reduction <add>, %43, %cst_39 [0] : vector<8x128xf32> to vector<128xf32>
      %50 = vector.shape_cast %49 : vector<128xf32> to vector<1x128xf32>
      %51 = vector.broadcast %44 : vector<1x128xf32> to vector<8x128xf32>
      %52 = arith.subf %34, %51 : vector<8x128xf32>
      %cst_40 = arith.constant -2.07944155 : f32
      %53 = vector.broadcast %cst_40 : f32 to vector<8x128xf32>
      %54 = arith.addf %52, %53 : vector<8x128xf32>
      %cst_41 = arith.constant dense<0xFF800000> : vector<128xf32>
      %55 = vector.multi_reduction <maximumf>, %54, %cst_41 [0] : vector<8x128xf32> to vector<128xf32>
      %56 = vector.shape_cast %55 : vector<128xf32> to vector<1x128xf32>
      %57 = vector.broadcast %56 : vector<1x128xf32> to vector<8x128xf32>
      %58 = arith.subf %54, %57 : vector<8x128xf32>
      %59 = math.exp %58 : vector<8x128xf32>
      %cst_42 = arith.constant dense<0.000000e+00> : vector<128xf32>
      %60 = vector.multi_reduction <add>, %59, %cst_42 [0] : vector<8x128xf32> to vector<128xf32>
      %61 = vector.shape_cast %60 : vector<128xf32> to vector<1x128xf32>
      %62 = math.log %61 : vector<1x128xf32>
      %63 = arith.addf %62, %56 : vector<1x128xf32>
      %cst_43 = arith.constant 9.99999993E-9 : f32
      %64 = vector.broadcast %cst_43 : f32 to vector<1x128xf32>
      %65 = arith.addf %50, %64 : vector<1x128xf32>
      %66 = tpu.reciprocal %65 {approx = true} : vector<1x128xf32> -> vector<1x128xf32>
      %67 = arith.mulf %48, %66 : vector<1x128xf32>
      %cst_44 = arith.constant 2.07944155 : f32
      %68 = vector.broadcast %cst_44 : f32 to vector<1x128xf32>
      %69 = arith.subf %63, %68 : vector<1x128xf32>
      %70 = arith.subf %67, %69 : vector<1x128xf32>
      %71 = arith.mulf %69, %69 : vector<1x128xf32>
      %cst_45 = arith.constant 1.000000e-01 : f32
      %72 = vector.broadcast %cst_45 : f32 to vector<1x128xf32>
      %73 = arith.mulf %71, %72 : vector<1x128xf32>
      %74 = arith.subf %70, %73 : vector<1x128xf32>
      %75 = arith.mulf %74, %45 : vector<1x128xf32>
      %cst_46 = arith.constant 0.000000e+00 : f32
      %76 = vector.broadcast %cst_46 : f32 to vector<1x128xf32>
      %77 = arith.select %37, %75, %76 : vector<1x128xi1>, vector<1x128xf32>
      %cst_47 = arith.constant dense<0.000000e+00> : vector<1xf32>
      %78 = vector.multi_reduction <add>, %77, %cst_47 [1] : vector<1x128xf32> to vector<1xf32>
      %79 = vector.shape_cast %78 : vector<1xf32> to vector<1x1xf32>
      %cst_48 = arith.constant 0.000000e+00 : f32
      %80 = vector.broadcast %cst_48 : f32 to vector<1x1xf32>
      %81 = arith.subf %80, %79 : vector<1x1xf32>
      %cst_49 = arith.constant -1.000000e+30 : f32
      %82 = vector.shape_cast %37 : vector<1x128xi1> to vector<1x128xi1>
      %83 = vector.broadcast %82 : vector<1x128xi1> to vector<8x128xi1>
      %84 = vector.broadcast %cst_49 : f32 to vector<8x128xf32>
      %85 = arith.select %83, %34, %84 : vector<8x128xi1>, vector<8x128xf32>
      %86 = vector.broadcast %44 : vector<1x128xf32> to vector<8x128xf32>
      %87 = arith.addf %85, %86 : vector<8x128xf32>
      %cst_50 = arith.constant dense<0xFF800000> : vector<8xf32>
      %88 = vector.multi_reduction <maximumf>, %87, %cst_50 [1] : vector<8x128xf32> to vector<8xf32>
      %89 = vector.shape_cast %88 : vector<8xf32> to vector<8x1xf32>
      %90 = vector.broadcast %89 : vector<8x1xf32> to vector<8x128xf32>
      %91 = arith.subf %87, %90 : vector<8x128xf32>
      %92 = math.exp %91 : vector<8x128xf32>
      %cst_51 = arith.constant dense<0.000000e+00> : vector<8xf32>
      %93 = vector.multi_reduction <add>, %92, %cst_51 [1] : vector<8x128xf32> to vector<8xf32>
      %94 = vector.shape_cast %93 : vector<8xf32> to vector<8x1xf32>
      %95 = math.log %94 : vector<8x1xf32>
      %96 = vector.broadcast %95 : vector<8x1xf32> to vector<8x128xf32>
      %97 = arith.subf %91, %96 : vector<8x128xf32>
      %cst_52 = arith.constant 0.000000e+00 : f32
      %98 = vector.broadcast %cst_52 : f32 to vector<8x128xf32>
      %99 = arith.subf %98, %97 : vector<8x128xf32>
      %100 = arith.mulf %43, %99 : vector<8x128xf32>
      %101 = vector.shape_cast %100 : vector<8x128xf32> to vector<1x8x128xf32>
      %cst_53 = arith.constant dense<0.000000e+00> : vector<1xf32>
      %102 = vector.multi_reduction <add>, %101, %cst_53 [1, 2] : vector<1x8x128xf32> to vector<1xf32>
      %103 = vector.shape_cast %102 : vector<1xf32> to vector<1x1x1xf32>
      %104 = vector.extract %103[0, 0, 0] : f32 from vector<1x1x1xf32>
      %105 = vector.broadcast %104 : f32 to vector<1x1xf32>
      %cst_54 = arith.constant 1.250000e-01 : f32
      %106 = vector.broadcast %cst_54 : f32 to vector<1x1xf32>
      %107 = arith.mulf %105, %106 : vector<1x1xf32>
      %cst_55 = arith.constant 1.000000e-01 : f32
      %108 = vector.broadcast %cst_55 : f32 to vector<1x1xf32>
      %109 = arith.mulf %81, %108 : vector<1x1xf32>
      %110 = arith.addf %109, %107 : vector<1x1xf32>
      %cst_56 = arith.constant dense<0.000000e+00> : vector<128xf32>
      %111 = vector.multi_reduction <add>, %22, %cst_56 [0] : vector<8x128xf32> to vector<128xf32>
      %112 = vector.shape_cast %111 : vector<128xf32> to vector<1x128xf32>
      %cst_57 = arith.constant dense<0.000000e+00> : vector<128xf32>
      %113 = vector.multi_reduction <add>, %27, %cst_57 [0] : vector<8x128xf32> to vector<128xf32>
      %114 = vector.shape_cast %113 : vector<128xf32> to vector<1x128xf32>
      %115 = arith.subf %112, %114 : vector<1x128xf32>
      %cst_58 = arith.constant 1.250000e-01 : f32
      %116 = vector.broadcast %cst_58 : f32 to vector<1x128xf32>
      %117 = arith.mulf %115, %116 : vector<1x128xf32>
      %118 = arith.mulf %117, %117 : vector<1x128xf32>
      %cst_59 = arith.constant dense<0.000000e+00> : vector<1xf32>
      %119 = vector.multi_reduction <add>, %118, %cst_59 [1] : vector<1x128xf32> to vector<1xf32>
      %120 = vector.shape_cast %119 : vector<1xf32> to vector<1x1xf32>
      %c0_60 = arith.constant 0 : index
      %c0_61 = arith.constant 0 : index
      %121 = vector.load %arg10[%c0_60, %c0_61] : memref<8x128xf32, #tpu.memory_space<vmem>>, vector<8x128xf32>
      %cst_62 = arith.constant -1.000000e+30 : f32
      %122 = vector.shape_cast %37 : vector<1x128xi1> to vector<1x128xi1>
      %123 = vector.broadcast %122 : vector<1x128xi1> to vector<8x128xi1>
      %124 = vector.broadcast %cst_62 : f32 to vector<8x128xf32>
      %125 = arith.select %123, %121, %124 : vector<8x128xi1>, vector<8x128xf32>
      %c0_63 = arith.constant 0 : index
      %c0_64 = arith.constant 0 : index
      %126 = vector.load %arg11[%c0_63, %c0_64] : memref<8x128xf32, #tpu.memory_space<vmem>>, vector<8x128xf32>
      %cst_65 = arith.constant -1.000000e+30 : f32
      %127 = vector.shape_cast %37 : vector<1x128xi1> to vector<1x128xi1>
      %128 = vector.broadcast %127 : vector<1x128xi1> to vector<8x128xi1>
      %129 = vector.broadcast %cst_65 : f32 to vector<8x128xf32>
      %130 = arith.select %128, %126, %129 : vector<8x128xi1>, vector<8x128xf32>
      %cst_66 = arith.constant dense<0xFF800000> : vector<8xf32>
      %131 = vector.multi_reduction <maximumf>, %125, %cst_66 [1] : vector<8x128xf32> to vector<8xf32>
      %132 = vector.shape_cast %131 : vector<8xf32> to vector<8x1xf32>
      %133 = vector.broadcast %132 : vector<8x1xf32> to vector<8x128xf32>
      %134 = arith.subf %125, %133 : vector<8x128xf32>
      %135 = math.exp %134 : vector<8x128xf32>
      %cst_67 = arith.constant dense<0.000000e+00> : vector<8xf32>
      %136 = vector.multi_reduction <add>, %135, %cst_67 [1] : vector<8x128xf32> to vector<8xf32>
      %137 = vector.shape_cast %136 : vector<8xf32> to vector<8x1xf32>
      %138 = math.log %137 : vector<8x1xf32>
      %139 = vector.broadcast %138 : vector<8x1xf32> to vector<8x128xf32>
      %140 = arith.subf %134, %139 : vector<8x128xf32>
      %141 = tpu.reciprocal %137 {approx = true} : vector<8x1xf32> -> vector<8x1xf32>
      %142 = vector.broadcast %141 : vector<8x1xf32> to vector<8x128xf32>
      %143 = arith.mulf %135, %142 : vector<8x128xf32>
      %cst_68 = arith.constant dense<0xFF800000> : vector<8xf32>
      %144 = vector.multi_reduction <maximumf>, %130, %cst_68 [1] : vector<8x128xf32> to vector<8xf32>
      %145 = vector.shape_cast %144 : vector<8xf32> to vector<8x1xf32>
      %146 = vector.broadcast %145 : vector<8x1xf32> to vector<8x128xf32>
      %147 = arith.subf %130, %146 : vector<8x128xf32>
      %148 = math.exp %147 : vector<8x128xf32>
      %cst_69 = arith.constant dense<0.000000e+00> : vector<8xf32>
      %149 = vector.multi_reduction <add>, %148, %cst_69 [1] : vector<8x128xf32> to vector<8xf32>
      %150 = vector.shape_cast %149 : vector<8xf32> to vector<8x1xf32>
      %151 = math.log %150 : vector<8x1xf32>
      %152 = vector.broadcast %151 : vector<8x1xf32> to vector<8x128xf32>
      %153 = arith.subf %147, %152 : vector<8x128xf32>
      %154 = arith.subf %140, %153 : vector<8x128xf32>
      %155 = arith.mulf %143, %154 : vector<8x128xf32>
      %cst_70 = arith.constant 0.000000e+00 : f32
      %156 = vector.shape_cast %37 : vector<1x128xi1> to vector<1x128xi1>
      %157 = vector.broadcast %156 : vector<1x128xi1> to vector<8x128xi1>
      %158 = vector.broadcast %cst_70 : f32 to vector<8x128xf32>
      %159 = arith.select %157, %155, %158 : vector<8x128xi1>, vector<8x128xf32>
      %cst_71 = arith.constant dense<0.000000e+00> : vector<8xf32>
      %160 = vector.multi_reduction <add>, %159, %cst_71 [1] : vector<8x128xf32> to vector<8xf32>
      %161 = vector.shape_cast %160 : vector<8xf32> to vector<8x1xf32>
      %cst_72 = arith.constant 5.000000e-01 : f32
      %162 = vector.broadcast %cst_72 : f32 to vector<8x1xf32>
      %163 = arith.mulf %162, %161 : vector<8x1xf32>
      %cst_73 = arith.constant dense<0.000000e+00> : vector<1xf32>
      %164 = vector.multi_reduction <add>, %163, %cst_73 [0] : vector<8x1xf32> to vector<1xf32>
      %165 = vector.shape_cast %164 : vector<1xf32> to vector<1x1xf32>
      %cst_74 = arith.constant 1.250000e-01 : f32
      %166 = vector.broadcast %cst_74 : f32 to vector<1x1xf32>
      %167 = arith.mulf %165, %166 : vector<1x1xf32>
      %168 = vector.broadcast %167 : vector<1x1xf32> to vector<8x1xf32>
      %169 = arith.subf %163, %168 : vector<8x1xf32>
      %170 = arith.mulf %169, %169 : vector<8x1xf32>
      %cst_75 = arith.constant dense<0.000000e+00> : vector<1xf32>
      %171 = vector.multi_reduction <add>, %170, %cst_75 [0] : vector<8x1xf32> to vector<1xf32>
      %172 = vector.shape_cast %171 : vector<1xf32> to vector<1x1xf32>
      %cst_76 = arith.constant 0.142857149 : f32
      %173 = vector.broadcast %cst_76 : f32 to vector<1x1xf32>
      %174 = arith.mulf %172, %173 : vector<1x1xf32>
      %175 = math.sqrt %174 : vector<1x1xf32>
      %cst_77 = arith.constant 9.99999996E-13 : f32
      %176 = vector.broadcast %cst_77 : f32 to vector<1x1xf32>
      %177 = arith.maximumf %175, %176 : vector<1x1xf32>
      %178 = tpu.reciprocal %177 {approx = true} : vector<1x1xf32> -> vector<1x1xf32>
      %179 = arith.subf %167, %177 : vector<1x1xf32>
      %180 = arith.addf %167, %177 : vector<1x1xf32>
      %181 = vector.broadcast %179 : vector<1x1xf32> to vector<8x1xf32>
      %182 = arith.subf %181, %163 : vector<8x1xf32>
      %183 = vector.broadcast %178 : vector<1x1xf32> to vector<8x1xf32>
      %184 = arith.mulf %182, %183 : vector<8x1xf32>
      %cst_78 = arith.constant 4.000000e+00 : f32
      %185 = vector.broadcast %cst_78 : f32 to vector<8x1xf32>
      %186 = arith.mulf %184, %185 : vector<8x1xf32>
      %cst_79 = arith.constant 1.000000e+00 : f32
      %187 = vector.broadcast %cst_79 : f32 to vector<8x1xf32>
      %188 = arith.addf %187, %186 : vector<8x1xf32>
      %189 = tpu.reciprocal %188 {approx = true} : vector<8x1xf32> -> vector<8x1xf32>
      %190 = vector.broadcast %177 : vector<1x1xf32> to vector<8x1xf32>
      %191 = arith.subf %163, %190 : vector<8x1xf32>
      %192 = vector.broadcast %167 : vector<1x1xf32> to vector<8x1xf32>
      %193 = arith.subf %191, %192 : vector<8x1xf32>
      %194 = vector.broadcast %178 : vector<1x1xf32> to vector<8x1xf32>
      %195 = arith.mulf %193, %194 : vector<8x1xf32>
      %cst_80 = arith.constant 4.000000e+00 : f32
      %196 = vector.broadcast %cst_80 : f32 to vector<8x1xf32>
      %197 = arith.mulf %195, %196 : vector<8x1xf32>
      %cst_81 = arith.constant 1.000000e+00 : f32
      %198 = vector.broadcast %cst_81 : f32 to vector<8x1xf32>
      %199 = arith.addf %198, %197 : vector<8x1xf32>
      %200 = vector.broadcast %179 : vector<1x1xf32> to vector<8x1xf32>
      %201 = arith.cmpf olt, %163, %200 : vector<8x1xf32>
      %202 = vector.broadcast %180 : vector<1x1xf32> to vector<8x1xf32>
      %203 = arith.cmpf ogt, %163, %202 : vector<8x1xf32>
      %cst_82 = arith.constant 1.000000e+00 : f32
      %204 = vector.broadcast %cst_82 : f32 to vector<8x1xf32>
      %205 = arith.select %203, %199, %204 : vector<8x1xi1>, vector<8x1xf32>
      %206 = arith.select %201, %189, %205 : vector<8x1xi1>, vector<8x1xf32>
      %cst_83 = arith.constant 1.000000e-01 : f32
      %cst_84 = arith.constant 1.000000e+01 : f32
      %207 = vector.broadcast %cst_83 : f32 to vector<8x1xf32>
      %208 = arith.maximumf %207, %206 : vector<8x1xf32>
      %209 = vector.broadcast %cst_84 : f32 to vector<8x1xf32>
      %210 = arith.minimumf %209, %208 : vector<8x1xf32>
      %211 = vector.shape_cast %210 : vector<8x1xf32> to vector<8x1xf32>
      %212 = vector.broadcast %211 : vector<8x1xf32> to vector<8x128xf32>
      %c0_85 = arith.constant 0 : index
      %c0_86 = arith.constant 0 : index
      %213 = vector.load %arg13[%c0_85, %c0_86] : memref<8x128xf32, #tpu.memory_space<vmem>>, vector<8x128xf32>
      tpu.vector_store %arg13[%c0_85, %c0_86], %212 {strides = array<i32>} : memref<8x128xf32, #tpu.memory_space<vmem>>, vector<8x128xf32>,
      %214 = tpu.iota {dimensions = array<i32: 1>} : vector<1x128xi32>
      %c0_i32_87 = arith.constant 0 : i32
      %215 = vector.broadcast %c0_i32_87 : i32 to vector<1x128xi32>
      %216 = arith.cmpi eq, %214, %215 : vector<1x128xi32>
      %c1_i32 = arith.constant 1 : i32
      %217 = vector.broadcast %c1_i32 : i32 to vector<1x128xi32>
      %218 = arith.cmpi eq, %214, %217 : vector<1x128xi32>
      %cst_88 = arith.constant 0.000000e+00 : f32
      %219 = vector.shape_cast %120 : vector<1x1xf32> to vector<1x1xf32>
      %220 = vector.broadcast %219 : vector<1x1xf32> to vector<1x128xf32>
      %221 = vector.broadcast %cst_88 : f32 to vector<1x128xf32>
      %222 = arith.select %218, %220, %221 : vector<1x128xi1>, vector<1x128xf32>
      %223 = vector.shape_cast %110 : vector<1x1xf32> to vector<1x1xf32>
      %224 = vector.broadcast %223 : vector<1x1xf32> to vector<1x128xf32>
      %225 = arith.select %216, %224, %222 : vector<1x128xi1>, vector<1x128xf32>
      %c0_89 = arith.constant 0 : index
      %c0_90 = arith.constant 0 : index
      %226 = vector.load %arg14[%c0_89, %c0_90] : memref<1x128xf32, #tpu.memory_space<vmem>>, vector<1x128xf32>
      tpu.vector_store %arg14[%c0_89, %c0_90], %225 {strides = array<i32>} : memref<1x128xf32, #tpu.memory_space<vmem>>, vector<1x128xf32>,
    } else {
    }
    return
  }
  func.func @transform_0(%arg0: i32) -> (i32, i32) {
    %c0_i32 = arith.constant 0 : i32
    %c0_i32_0 = arith.constant 0 : i32
    return %c0_i32, %arg0 : i32, i32
  }
  func.func @transform_1(%arg0: i32) -> (i32, i32) {
    %c0_i32 = arith.constant 0 : i32
    %c0_i32_0 = arith.constant 0 : i32
    return %c0_i32, %arg0 : i32, i32
  }
  func.func @transform_2(%arg0: i32) -> (i32, i32) {
    %c0_i32 = arith.constant 0 : i32
    %c0_i32_0 = arith.constant 0 : i32
    return %arg0, %c0_i32 : i32, i32
  }
  func.func @transform_3(%arg0: i32) -> (i32, i32) {
    %c0_i32 = arith.constant 0 : i32
    %c0_i32_0 = arith.constant 0 : i32
    %c0_i32_1 = arith.constant 0 : i32
    return %c0_i32, %c0_i32_0 : i32, i32
  }
  func.func @transform_4(%arg0: i32) -> (i32, i32) {
    %c0_i32 = arith.constant 0 : i32
    %c0_i32_0 = arith.constant 0 : i32
    %c0_i32_1 = arith.constant 0 : i32
    return %c0_i32, %c0_i32_0 : i32, i32
  }
  func.func @transform_5(%arg0: i32) -> (i32, i32) {
    %c0_i32 = arith.constant 0 : i32
    %c0_i32_0 = arith.constant 0 : i32
    %c0_i32_1 = arith.constant 0 : i32
    return %c0_i32, %c0_i32_0 : i32, i32
  }
  func.func @transform_6(%arg0: i32) -> (i32, i32) {
    %c0_i32 = arith.constant 0 : i32
    %c0_i32_0 = arith.constant 0 : i32
    %c0_i32_1 = arith.constant 0 : i32
    return %c0_i32, %c0_i32_0 : i32, i32
  }
  func.func @transform_7(%arg0: i32) -> (i32, i32) {
    %c0_i32 = arith.constant 0 : i32
    %c0_i32_0 = arith.constant 0 : i32
    %c0_i32_1 = arith.constant 0 : i32
    return %c0_i32, %c0_i32_0 : i32, i32
  }
  func.func @transform_8(%arg0: i32) -> (i32, i32) {
    %c0_i32 = arith.constant 0 : i32
    %c0_i32_0 = arith.constant 0 : i32
    %c0_i32_1 = arith.constant 0 : i32
    return %c0_i32, %c0_i32_0 : i32, i32
  }
  func.func @transform_9(%arg0: i32) -> (i32, i32) {
    %c0_i32 = arith.constant 0 : i32
    %c0_i32_0 = arith.constant 0 : i32
    %c0_i32_1 = arith.constant 0 : i32
    return %c0_i32, %c0_i32_0 : i32, i32
  }
  func.func @transform_10(%arg0: i32) -> (i32, i32) {
    %c0_i32 = arith.constant 0 : i32
    %c0_i32_0 = arith.constant 0 : i32
    %c0_i32_1 = arith.constant 0 : i32
    return %c0_i32, %c0_i32_0 : i32, i32
  }
  func.func @transform_11(%arg0: i32) -> (i32, i32) {
    %c0_i32 = arith.constant 0 : i32
    %c0_i32_0 = arith.constant 0 : i32
    %c0_i32_1 = arith.constant 0 : i32
    return %c0_i32, %c0_i32_0 : i32, i32
  }
  func.func @transform_12(%arg0: i32) -> (i32, i32) {
    %c0_i32 = arith.constant 0 : i32
    %c0_i32_0 = arith.constant 0 : i32
    %c0_i32_1 = arith.constant 0 : i32
    return %c0_i32, %c0_i32_0 : i32, i32
  }
  func.func @transform_13(%arg0: i32) -> (i32, i32) {
    %c0_i32 = arith.constant 0 : i32
    %c0_i32_0 = arith.constant 0 : i32
    %c0_i32_1 = arith.constant 0 : i32
    return %c0_i32, %c0_i32_0 : i32, i32
  }
}

</mosaic_0001>

<bundles_post_ra>
// kernel: tpu_custom_call.1
= control target key start
LH: loop header
LB: loop body
LE: loop exit
PB: predicated region body
PF: predicated region fallthrough
CT: control target
= control target key end

     0   :  { %19 = vsyncpa [#allocation5], 0  ;;  %s1213_s0 = inlined_call_operand.hbm [shape: bf16[8,128], index: 0, kind: input, shape index: {}]   ;;  %s1214_s1 = inlined_call_operand.hbm [shape: bf16[8,128], index: 1, kind: input, shape index: {}]   ;;  %s1215_s2 = inlined_call_operand.hbm [shape: bf16[128,128], index: 2, kind: input, shape index: {}]   ;;  %s1216_s3 = inlined_call_operand.vmem [shape: f32[1,128], index: 3, kind: input, shape index: {}]   ;;  %s1217_s4 = inlined_call_operand.hbm [shape: bf16[128,128], index: 4, kind: input, shape index: {}]   ;;  %s1218_s5 = inlined_call_operand.vmem [shape: f32[1,128], index: 5, kind: input, shape index: {}]   ;;  %s1219_s6 = inlined_call_operand.vmem [shape: f32[1,128], index: 6, kind: input, shape index: {}]   ;;  %s1220_s7 = inlined_call_operand.vmem [shape: f32[1,128], index: 7, kind: input, shape index: {}]   ;;  %s1221_s8 = inlined_call_operand.vmem [shape: s32[8,1], index: 8, kind: input, shape index: {}]   ;;  %s1222_s9 = inlined_call_operand.vmem [shape: f32[8,128], index: 9, kind: input, shape index: {}]   ;;  %s1223_s10 = inlined_call_operand.vmem [shape: f32[8,128], index: 10, kind: input, shape index: {}]   ;;  %s1224_s11 = inlined_call_operand.hbm [shape: f32[8,128], index: 11, kind: output, shape index: {0}]   ;;  %s1225_s12 = inlined_call_operand.hbm [shape: f32[8,128], index: 12, kind: output, shape index: {1}]   ;;  %s1226_s13 = inlined_call_operand.hbm [shape: f32[1,128], index: 13, kind: output, shape index: {2}]  }
   0x1   :  { %20 = vsyncpa [#allocation8], 0 }
   0x2   :  { %21 = vsyncpa [#allocation11], 0 }
   0x3   :  { %22 = vsyncpa [#allocation6], 0 }
   0x4   :  { %23 = vsyncpa [#allocation14], 0  ;;  %s948_s25 = smov [#allocation7]   ;;  %s949_s27 = smov [#allocation4]  }
   0x5   :  { %s40_s26 = sshll.u32 %s948_s25, 4  ;;  %s30_s28 = sshll.u32 %s949_s27, 4  ;;  %s41_s26 = int_to_ptr.vmem [resolvable:$true] %s40_s26  ;;  %s31_s28 = int_to_ptr.vmem [resolvable:$true] %s30_s28 }
   0x6   :  { %s784_s14 = scalar_lea.hbm %s1214_s1, 64 }
   0x7   :  { %p785_p0 = scmp.ne.s32.totalorder %s1214_s1, %s784_s14  ;;  %p788_p1 = scmp.lt.u32.totalorder %s784_s14, %s1214_s1 }
   0x9   :  { %p790_p2 = pnand %p788_p1, %p785_p0 }
   0xb   :  { %793 = shalt.err (!%p790_p2)
}
   0xc   :  { %s794_s19 = scalar_lea.vmem %s41_s26, 64  ;;  %p799_p4 = scmp.lt.s32.totalorder %s41_s26, %s41_s26 }
   0xd   :  { %p795_p3 = scmp.ne.s32.totalorder %s41_s26, %s794_s19  ;;  %p800_p5 = scmp.lt.s32.totalorder %s794_s19, %s794_s19 }
   0xf   :  { %p801_p6 = por %p800_p5, %p799_p4 }
  0x11   :  { %p802_p7 = pnand %p801_p6, %p795_p3 }
  0x13   :  { %805 = shalt.err (!%p802_p7)
}
  0x14   :  { %43 = dma.hbm_to_vmem [thread:$0]  %s1214_s1, 64, %s41_s26, [#allocation8]  }
  0x15   :  { %s806_s24 = scalar_lea.hbm %s1213_s0, 64 }
  0x16   :  { %p807_p8 = scmp.ne.s32.totalorder %s1213_s0, %s806_s24  ;;  %p810_p9 = scmp.lt.u32.totalorder %s806_s24, %s1213_s0 }
  0x18   :  { %p812_p10 = pnand %p810_p9, %p807_p8 }
  0x1a   :  { %815 = shalt.err (!%p812_p10)
}
  0x1b   :  { %s816_s14 = scalar_lea.vmem %s31_s28, 64  ;;  %p821_p12 = scmp.lt.s32.totalorder %s31_s28, %s31_s28 }
  0x1c   :  { %p817_p11 = scmp.ne.s32.totalorder %s31_s28, %s816_s14  ;;  %p822_p13 = scmp.lt.s32.totalorder %s816_s14, %s816_s14 }
  0x1e   :  { %p823_p0 = por %p822_p13, %p821_p12 }
  0x20   :  { %p824_p1 = pnand %p823_p0, %p817_p11 }
  0x22   :  { %827 = shalt.err (!%p824_p1)
}
  0x23   :  { %33 = dma.hbm_to_vmem [thread:$0]  %s1213_s0, 64, %s31_s28, [#allocation5]  }
  0x24   :  { %s950_s15 = smov [#allocation9]   ;;  %s828_s19 = scalar_lea.hbm %s1215_s2, 1024 }
  0x25   :  { %s49_s16 = sshll.u32 %s950_s15, 4  ;;  %p829_p2 = scmp.ne.s32.totalorder %s1215_s2, %s828_s19  ;;  %s50_s16 = int_to_ptr.vmem [resolvable:$true] %s49_s16 }
  0x26   :  { %p832_p3 = scmp.lt.u32.totalorder %s828_s19, %s1215_s2 }
  0x28   :  { %p834_p4 = pnand %p832_p3, %p829_p2 }
  0x2a   :  { %837 = shalt.err (!%p834_p4)
}
  0x2b   :  { %s838_s24 = scalar_lea.vmem %s50_s16, 1024  ;;  %p843_p6 = scmp.lt.s32.totalorder %s50_s16, %s50_s16 }
  0x2c   :  { %p839_p5 = scmp.ne.s32.totalorder %s50_s16, %s838_s24  ;;  %p844_p7 = scmp.lt.s32.totalorder %s838_s24, %s838_s24 }
  0x2e   :  { %p845_p8 = por %p844_p7, %p843_p6 }
  0x30   :  { %p846_p9 = pnand %p845_p8, %p839_p5 }
  0x32   :  { %849 = shalt.err (!%p846_p9)
}
  0x33   :  { %s951_s0 = smov 64   ;;  %s952_s28 = smov 4  }
  0x34   :  { %55 = dma.hbm_to_vmem [thread:$0]  %s1215_s2, 1024, %s50_s16, [#allocation8], %s951_s0, %s951_s0, %s952_s28  }
  0x35   :  { %s953_s29 = smov [#allocation10]   ;;  %s850_s26 = scalar_lea.hbm %s1217_s4, 1024 }
  0x36   :  { %s63_s30 = sshll.u32 %s953_s29, 4  ;;  %p851_p10 = scmp.ne.s32.totalorder %s1217_s4, %s850_s26  ;;  %s64_s30 = int_to_ptr.vmem [resolvable:$true] %s63_s30 }
  0x37   :  { %p854_p11 = scmp.lt.u32.totalorder %s850_s26, %s1217_s4 }
  0x39   :  { %p856_p12 = pnand %p854_p11, %p851_p10 }
  0x3b   :  { %859 = shalt.err (!%p856_p12)
}
  0x3c   :  { %s860_s20 = scalar_lea.vmem %s64_s30, 1024  ;;  %p865_p0 = scmp.lt.s32.totalorder %s64_s30, %s64_s30 }
  0x3d   :  { %p861_p13 = scmp.ne.s32.totalorder %s64_s30, %s860_s20  ;;  %p866_p1 = scmp.lt.s32.totalorder %s860_s20, %s860_s20 }
  0x3f   :  { %p867_p2 = por %p866_p1, %p865_p0 }
  0x41   :  { %p868_p3 = pnand %p867_p2, %p861_p13 }
  0x43   :  { %871 = shalt.err (!%p868_p3)
}
  0x44   :  { %69 = dma.hbm_to_vmem [thread:$0]  %s1217_s4, 1024, %s64_s30, [#allocation11], %s951_s0, %s951_s0, %s952_s28  }
  0x45   :  { %938 = dma.done.wait [#allocation5], 64  }
  0x46   :  { %939 = vsyncadd [#allocation5], 4294967232 }
  0x47   :  { %940 = dma.done.wait [#allocation8], 1088  }
  0x48   :  { %941 = vsyncadd [#allocation8], 4294966208 }
  0x49   :  { %942 = dma.done.wait [#allocation11], 1024  }
  0x4a   :  { %943 = vsyncadd [#allocation11], 4294966272  ;;  %v954_v0 = vmov 0.0   ;;  %vm955_vm0 = vmmov 0   ;;  %v382_v1 = vlaneseq  ;;  %v742_v2 = vld [vmem:[#allocation9] sm:$0xff]   ;;  %v743_v3 = vld [vmem:[#allocation9 + $0x8] sm:$0xff]  }
  0x4b   :  { %667 = vmatprep.subr.bf16.mxu0 %v954_v0  ;;  %687 = vmatprep.subr.bf16.mxu1 %v954_v0  ;;  %v744_v5 = vld [vmem:[#allocation9 + $0x10] sm:$0xff]   ;;  %v494_v6 = vld [vmem:[%s1222_s9] sm:$0xff]  ;;  %v746_v11 = vld [vmem:[#allocation9 + $0x20] sm:$0xff]   ;;  %v956_v25 = vmov 0   ;;  %vm443_vm3 = vcmask 1040384   ;;  %s958_s29 = smov [#allocation12]  }
  0x4c   :  { %683 = vmatprep.mubr.msk.bf16.mxu0 %vm955_vm0, %v954_v0  ;;  %703 = vmatprep.mubr.msk.bf16.mxu1 %vm955_vm0, %v954_v0  ;;  %v1084_v4 = vand.u32 127, %v382_v1  ;;  %v745_v7 = vld [vmem:[#allocation9 + $0x18] sm:$0xff]   ;;  %v747_v12 = vld [vmem:[#allocation9 + $0x28] sm:$0xff]   ;;  %v748_v13 = vld [vmem:[#allocation9 + $0x30] sm:$0xff]   ;;  %s581_s30 = sshll.u32 %s958_s29, 4  ;;  %s582_s30 = int_to_ptr.vmem [resolvable:$true] %s581_s30 }
  0x4d   :  { %668 = vmatpush3.bf16.msra.mxu0 %v742_v2  ;;  %688 = vmatpush3.bf16.msra.mxu1 %v742_v2  ;;  %v496_v9 = vld [vmem:[%s1223_s10] sm:$0xff]  ;;  %v750_v17 = vld [vmem:[#allocation10] sm:$0xff]   ;;  %v751_v18 = vld [vmem:[#allocation10 + $0x8] sm:$0xff]  }
  0x4e   :  { %669 = vmatprep.subr.bf16.mxu0 %v954_v0  ;;  %689 = vmatprep.subr.bf16.mxu1 %v954_v0  ;;  %vm384_vm1 = vcmp.lt.s32.totalorder %v1084_v4, 8  ;;  %v749_v14 = vld [vmem:[#allocation9 + $0x38] sm:$0xff]   ;;  %v752_v19 = vld [vmem:[#allocation10 + $0x10] sm:$0xff]   ;;  %v754_v21 = vld [vmem:[#allocation10 + $0x20] sm:$0xff]  }
  0x4f   :  { %v1096_v8 = vsel %vm384_vm1, %v494_v6, -1e+30  ;;  %v497_v10 = vsel %vm384_vm1, %v496_v9, -1e+30  ;;  %v118_v15 = vld [vmem:[#allocation4] sm:$0xf]  ;;  %741 = vset.pattern.permute.xlu0 %v956_v25 }
  0x50   :  { %498 = vmax.xlane.f32.xlu0 %v1096_v8  ;;  %v210_v16 = vld [vmem:[#allocation7] sm:$0xf]  ;;  %v755_v22 = vld [vmem:[#allocation10 + $0x28] sm:$0xff]   ;;  %v756_v23 = vld [vmem:[#allocation10 + $0x30] sm:$0xff]  }
  0x51   :  { %670 = vmatpush3.bf16.msra.mxu0 %v743_v3  ;;  %690 = vmatpush3.bf16.msra.mxu1 %v743_v3  ;;  %v753_v20 = vld [vmem:[#allocation10 + $0x18] sm:$0xff]  }
  0x52   :  { %671 = vmatprep.subr.bf16.mxu0 %v954_v0  ;;  %691 = vmatprep.subr.bf16.mxu1 %v954_v0  ;;  %v757_v24 = vld [vmem:[#allocation10 + $0x38] sm:$0xff]  }
  0x53   :  { %v385_v31 = vld [vmem:[%s1221_s8] sm:$0xff] }
  0x54   :  { %510 = vmax.xlane.f32.xlu0 %v497_v10  ;;  %v627_v32 = vld [vmem:[%s1216_s3] ss:$0 sm:$0xff] }
  0x55   :  { %672 = vmatpush3.bf16.msra.mxu0 %v744_v5  ;;  %692 = vmatpush3.bf16.msra.mxu1 %v744_v5  ;;  %v628_v61 = vld [vmem:[%s1218_s5] ss:$0 sm:$0xff] }
  0x56   :  { %673 = vmatprep.subr.bf16.mxu0 %v954_v0  ;;  %693 = vmatprep.subr.bf16.mxu1 %v954_v0  ;;  %v638_v63 = vld [vmem:[%s1219_s6] ss:$0 sm:$0xff] }
  0x59   :  { %674 = vmatpush3.bf16.msra.mxu0 %v745_v7  ;;  %694 = vmatpush3.bf16.msra.mxu1 %v745_v7 }
  0x5a   :  { %675 = vmatprep.subr.bf16.mxu0 %v954_v0  ;;  %695 = vmatprep.subr.bf16.mxu1 %v954_v0 }
  0x5d   :  { %676 = vmatpush3.bf16.msra.mxu0 %v746_v11  ;;  %696 = vmatpush3.bf16.msra.mxu1 %v746_v11 }
  0x5e   :  { %677 = vmatprep.subr.bf16.mxu0 %v954_v0  ;;  %697 = vmatprep.subr.bf16.mxu1 %v954_v0 }
  0x61   :  { %678 = vmatpush3.bf16.msra.mxu0 %v747_v12  ;;  %698 = vmatpush3.bf16.msra.mxu1 %v747_v12 }
  0x62   :  { %679 = vmatprep.subr.bf16.mxu0 %v954_v0  ;;  %699 = vmatprep.subr.bf16.mxu1 %v954_v0 }
  0x65   :  { %680 = vmatpush3.bf16.msra.mxu0 %v748_v13  ;;  %700 = vmatpush3.bf16.msra.mxu1 %v748_v13 }
  0x66   :  { %681 = vmatprep.subr.bf16.mxu0 %v954_v0  ;;  %701 = vmatprep.subr.bf16.mxu1 %v954_v0 }
  0x69   :  { %682 = vmatpush3.bf16.msra.mxu0 %v749_v14  ;;  %702 = vmatpush3.bf16.msra.mxu1 %v749_v14 }
  0x6a   :  { %707 = vmatprep.subr.bf16.mxu0 %v954_v0 }
  0x6c   :  { %684 = vmatmul.mubr.bf16.vlgmr.msra.gmra.mrb[0].mxu0 %v118_v15  ;;  %704 = vmatmul.mubr.bf16.vlgmr.msra.gmra.mrb[0].mxu1 %v210_v16 }
  0x6d   :  { %708 = vmatpush3.bf16.msra.mxu0 %v750_v17  ;;  %723 = vmatprep.mubr.msk.bf16.mxu0 %vm955_vm0, %v954_v0 }
  0x6e   :  { %709 = vmatprep.subr.bf16.mxu0 %v954_v0 }
  0x71   :  { %710 = vmatpush3.bf16.msra.mxu0 %v751_v18 }
  0x72   :  { %711 = vmatprep.subr.bf16.mxu0 %v954_v0 }
  0x75   :  { %712 = vmatpush3.bf16.msra.mxu0 %v752_v19 }
  0x76   :  { %713 = vmatprep.subr.bf16.mxu0 %v954_v0 }
  0x79   :  { %714 = vmatpush3.bf16.msra.mxu0 %v753_v20 }
  0x7a   :  { %715 = vmatprep.subr.bf16.mxu0 %v954_v0 }
  0x7d   :  { %716 = vmatpush3.bf16.msra.mxu0 %v754_v21 }
  0x7e   :  { %717 = vmatprep.subr.bf16.mxu0 %v954_v0 }
  0x81   :  { %718 = vmatpush3.bf16.msra.mxu0 %v755_v22 }
  0x82   :  { %719 = vmatprep.subr.bf16.mxu0 %v954_v0 }
  0x85   :  { %720 = vmatpush3.bf16.msra.mxu0 %v756_v23 }
  0x86   :  { %721 = vmatprep.subr.bf16.mxu0 %v954_v0 }
  0x89   :  { %722 = vmatpush3.bf16.msra.mxu0 %v757_v24 }
  0xdd   :  { %v499_v26 = vpop.xlane.xlu0 %498 }
  0xde   :  { %v1140_v59 = vsub.f32 %v1096_v8, %v499_v26 }
  0xe0   :  { %v501_v60 = vmul.f32 1.442695, %v1140_v59 }
  0xe1   :  { %v511_v27 = vpop.xlane.xlu0 %510 }
  0xe2   :  { %v1124_v28 = vsub.f32 %v497_v10, %v511_v27 }
  0xe4   :  { %v513_v29 = vmul.f32 1.442695, %v1124_v28 }
  0xe6   :  { %758 = vpow2.f32 %v513_v29 }
  0xe7   :  { %760 = vpow2.f32 %v501_v60 }
  0xf0   :  { %v759_v30 = vpop.eup %758 }
  0xf1   :  { %515 = vadd.xlane.f32.xlu0 %v759_v30  ;;  %v1151_v11 = vpop.eup %760 }
 0x107   :  { %387 = vperm.xlu0 %741, %v385_v31  }
 0x13f   :  { %v201_v33 = vpop.f32.mrb[0].mxu0  ;;  %v245_v34 = vpop.f32.mrb[0].mxu1 }
 0x140   :  { %v264_v35 = vadd.f32 %v627_v32, %v201_v33  ;;  %v267_v36 = vadd.f32 %v627_v32, %v245_v34  ;;  %v685_v37 = vpop.f32.mrb[1].mxu0  ;;  %v705_v38 = vpop.f32.mrb[1].mxu1 }
 0x141   :  { %v204_v39 = vpop.f32.mrb[2].mxu0  ;;  %v248_v40 = vpop.f32.mrb[2].mxu1 }
 0x142   :  { %v265_v41 = vmax.f32 %v264_v35, 0.0  ;;  %v268_v42 = vmax.f32 %v267_v36, 0.0  ;;  %v686_v43 = vpop.f32.mrb[3].mxu0  ;;  %v706_v44 = vpop.f32.mrb[3].mxu1 }
 0x144   :  { %v477_v45 = vrot.slane %v265_v41, 4  ;;  %269 = vst [vmem:[#allocation12] sm:$0xff] %v265_v41  ;;  %v483_v46 = vrot.slane %v268_v42, 4  ;;  %v270_v47 = vpack.c.bf16 %v265_v41, %v265_v41 }
 0x146   :  { %v484_v48 = vadd.f32 %v483_v46, %v268_v42  ;;  %724 = vmatmul.mubr.bf16.vlgmr.msra.gmra.mrb[4].mxu0 %v270_v47  ;;  %v478_v49 = vadd.f32 %v477_v45, %v265_v41 }
 0x148   :  { %v485_v50 = vrot.slane %v484_v48, 2  ;;  %v479_v51 = vrot.slane %v478_v49, 2 }
 0x14a   :  { %v486_v52 = vadd.f32 %v485_v50, %v484_v48  ;;  %v480_v53 = vadd.f32 %v479_v51, %v478_v49 }
 0x14c   :  { %v481_v54 = vrot.slane %v480_v53, 1  ;;  %v487_v55 = vrot.slane %v486_v52, 1 }
 0x14e   :  { %v1133_v56 = vadd.f32 %v481_v54, %v480_v53  ;;  %v1135_v57 = vadd.f32 %v487_v55, %v486_v52 }
 0x150   :  { %v489_v58 = vsub.f32 %v1133_v56, %v1135_v57 }
 0x17e   :  { %v516_v9 = vpop.xlane.xlu0 %515 }
 0x186   :  { %v388_v14 = vpop.permute.xlu0 %387 }
 0x187   :  { %vm389_vm2 = vcmp.eq.s32.totalorder %v1084_v4, %v388_v14 }
 0x188   :  { %v1156_v18 = vsel %vm389_vm2, 1.0, %v954_v0 }
 0x189   :  { %v401_v21 = vrot.slane %v1156_v18, 4 }
 0x18b   :  { %v402_v23 = vadd.f32 %v1156_v18, %v401_v21 }
 0x18d   :  { %v403_v24 = vrot.slane %v402_v23, 2 }
 0x18f   :  { %v404_v25 = vadd.f32 %v403_v24, %v402_v23 }
 0x191   :  { %v405_v30 = vrot.slane %v404_v25, 1 }
 0x193   :  { %v406_v0 = vadd.f32 %v405_v30, %v404_v25 }
 0x195   :  { %v433_v37 = vadd.f32 1e-08, %v406_v0 }
 0x219   :  { %v376_v62 = vpop.f32.mrb[4].mxu0 }
 0x21a   :  { %v377_v1 = vadd.f32 %v628_v61, %v376_v62  ;;  %v725_v2 = vpop.f32.mrb[5].mxu0 }
 0x21b   :  { %v379_v3 = vpop.f32.mrb[6].mxu0 }
 0x21c   :  { %v726_v5 = vpop.f32.mrb[7].mxu0  ;;  %v450_v6 = vsel %vm384_vm1, %v377_v1, -1e+30  ;;  %v413_v7 = vsub.f32 %v377_v1, %v638_v63  ;;  %v394_v27 = vmul.f32 %v1156_v18, %v377_v1 }
 0x21d   :  { %v451_v8 = vadd.f32 %v638_v63, %v450_v6 }
 0x21e   :  { %v414_v10 = vadd.f32 -2.0794415, %v413_v7  ;;  %v395_v32 = vrot.slane %v394_v27, 4 }
 0x21f   :  { %452 = vmax.xlane.f32.xlu1 %v451_v8 }
 0x220   :  { %v415_v12 = vrot.slane %v414_v10, 4  ;;  %v396_v35 = vadd.f32 %v395_v32, %v394_v27 }
 0x222   :  { %v416_v13 = vmax.f32 %v414_v10, %v415_v12  ;;  %v397_v39 = vrot.slane %v396_v35, 2 }
 0x223   :  { %503 = vadd.xlane.f32.xlu1 %v1151_v11 }
 0x224   :  { %v417_v15 = vrot.slane %v416_v13, 2  ;;  %v398_v40 = vadd.f32 %v397_v39, %v396_v35 }
 0x226   :  { %v418_v16 = vmax.f32 %v416_v13, %v417_v15  ;;  %v399_v41 = vrot.slane %v398_v40, 1 }
 0x228   :  { %v419_v17 = vrot.slane %v418_v16, 1  ;;  %v400_v43 = vadd.f32 %v399_v41, %v398_v40 }
 0x22a   :  { %v420_v19 = vmax.f32 %v418_v16, %v419_v17 }
 0x22c   :  { %v421_v20 = vsub.f32 %v414_v10, %v420_v19 }
 0x22e   :  { %v422_v22 = vmul.f32 1.442695, %v421_v20 }
 0x230   :  { %762 = vpow2.f32 %v422_v22 }
 0x23a   :  { %v763_v26 = vpop.eup %762 }
 0x23b   :  { %v424_v29 = vrot.slane %v763_v26, 4 }
 0x23d   :  { %v425_v31 = vadd.f32 %v763_v26, %v424_v29  ;;  %v490_v26 = vmul.f32 0.125, %v489_v58 }
 0x23f   :  { %v426_v33 = vrot.slane %v425_v31, 2 }
 0x241   :  { %v427_v34 = vadd.f32 %v426_v33, %v425_v31  ;;  %v491_v31 = vmul.f32 %v490_v26, %v490_v26 }
 0x243   :  { %v428_v36 = vrot.slane %v427_v34, 1 }
 0x245   :  { %v429_v38 = vadd.f32 %v428_v36, %v427_v34 }
 0x247   :  { %764 = vlog2.f32 %v429_v38 }
 0x248   :  { %766 = vrcp.f32 %v433_v37 }
 0x249   :  { %768 = vlog2.f32 %v516_v9 }
 0x251   :  { %v765_v42 = vpop.eup %764 }
 0x252   :  { %v431_v44 = vmul.f32 0.6931472, %v765_v42  ;;  %v767_v45 = vpop.eup %766 }
 0x253   :  { %v435_v47 = vmul.f32 %v767_v45, %v400_v43  ;;  %v769_v61 = vpop.eup %768 }
 0x254   :  { %v432_v46 = vadd.f32 %v431_v44, %v420_v19  ;;  %v518_v63 = vmul.f32 0.6931472, %v769_v61 }
 0x256   :  { %v639_v48 = vadd.f32 -2.0794415, %v432_v46  ;;  %v519_v5 = vsub.f32 %v1124_v28, %v518_v63  ;;  %v393_v28 = vld [vmem:[%s1220_s7] sm:$0x1]  ;;  %s957_s7 = smov [#allocation13]  }
 0x257   :  { %s591_s27 = sshll.u32 %s957_s7, 4  ;;  %s592_s27 = int_to_ptr.vmem [resolvable:$true] %s591_s27 }
 0x258   :  { %v437_v49 = vsub.f32 %v435_v47, %v639_v48  ;;  %v438_v50 = vmul.f32 %v639_v48, %v639_v48  ;;  %s872_s14 = scalar_lea.vmem %s592_s27, 128  ;;  %p877_p5 = scmp.lt.s32.totalorder %s592_s27, %s592_s27 }
 0x259   :  { %p873_p4 = scmp.ne.s32.totalorder %s592_s27, %s872_s14  ;;  %p878_p6 = scmp.lt.s32.totalorder %s872_s14, %s872_s14 }
 0x25a   :  { %v439_v51 = vmul.f32 0.1, %v438_v50 }
 0x25b   :  { %p879_p7 = por %p878_p6, %p877_p5 }
 0x25c   :  { %v440_v52 = vsub.f32 %v437_v49, %v439_v51 }
 0x25d   :  { %p880_p8 = pnand %p879_p7, %p873_p4 }
 0x25e   :  { %v441_v20 = vmul.f32 %v440_v52, %v393_v28 }
 0x260   :  { %v442_v24 = vsel %vm384_vm1, %v441_v20, 0.0 }
 0x261   :  { %v444_v27 = vsel %vm443_vm3, %v442_v24, 0.0 }
 0x2ac   :  { %v453_v53 = vpop.xlane.xlu1 %452 }
 0x2ad   :  { %v454_v54 = vsub.f32 %v451_v8, %v453_v53 }
 0x2af   :  { %v455_v55 = vmul.f32 1.442695, %v454_v54 }
 0x2b0   :  { %v504_v60 = vpop.xlane.xlu1 %503 }
 0x2b1   :  { %770 = vpow2.f32 %v455_v55 }
 0x2b2   :  { %772 = vlog2.f32 %v504_v60 }
 0x2b3   :  { %774 = vrcp.f32 %v504_v60 }
 0x2bb   :  { %v771_v62 = vpop.eup %770 }
 0x2bc   :  { %v773_v1 = vpop.eup %772  ;;  %457 = vadd.xlane.f32.xlu1 %v771_v62 }
 0x2bd   :  { %v506_v2 = vmul.f32 0.6931472, %v773_v1  ;;  %v775_v3 = vpop.eup %774 }
 0x2be   :  { %v509_v7 = vmul.f32 %v775_v3, %v1151_v11 }
 0x2bf   :  { %v507_v6 = vsub.f32 %v1140_v59, %v506_v2 }
 0x2c1   :  { %v520_v8 = vsub.f32 %v507_v6, %v519_v5 }
 0x2c3   :  { %v521_v9 = vmul.f32 %v520_v8, %v509_v7 }
 0x2c5   :  { %v522_v10 = vsel %vm384_vm1, %v521_v9, 0.0 }
 0x2c6   :  { %523 = vadd.xlane.f32.xlu1 %v522_v10 }
 0x349   :  { %v458_v12 = vpop.xlane.xlu1 %457 }
 0x34a   :  { %776 = vlog2.f32 %v458_v12 }
 0x353   :  { %v524_v13 = vpop.xlane.xlu1 %523 }
 0x354   :  { %v777_v14 = vpop.eup %776  ;;  %v525_v15 = vmul.f32 0.5, %v524_v13 }
 0x355   :  { %v460_v16 = vmul.f32 0.6931472, %v777_v14 }
 0x356   :  { %v526_v17 = vrot.slane %v525_v15, 4 }
 0x357   :  { %v461_v59 = vsub.f32 %v454_v54, %v460_v16 }
 0x358   :  { %v527_v19 = vadd.f32 %v526_v17, %v525_v15 }
 0x359   :  { %v462_v11 = vsub.f32 0.0, %v461_v59 }
 0x35a   :  { %v528_v21 = vrot.slane %v527_v19, 2 }
 0x35b   :  { %v463_v22 = vmul.f32 %v1156_v18, %v462_v11 }
 0x35c   :  { %v529_v23 = vadd.f32 %v528_v21, %v527_v19 }
 0x35d   :  { %464 = vadd.xlane.f32.xlu1 %v463_v22 }
 0x35e   :  { %v530_v25 = vrot.slane %v529_v23, 1 }
 0x360   :  { %v531_v29 = vadd.f32 %v530_v25, %v529_v23 }
 0x361   :  { %445 = vadd.xlane.f32.xlu1 %v444_v27 }
 0x362   :  { %v532_v30 = vmul.f32 0.125, %v531_v29 }
 0x364   :  { %v533_v32 = vsub.f32 %v525_v15, %v532_v30 }
 0x365   :  { %492 = vadd.xlane.f32.xlu1 %v491_v31 }
 0x366   :  { %v534_v33 = vmul.f32 %v533_v32, %v533_v32 }
 0x368   :  { %v535_v18 = vrot.slane %v534_v33, 4 }
 0x36a   :  { %v536_v0 = vadd.f32 %v535_v18, %v534_v33 }
 0x36c   :  { %v537_v34 = vrot.slane %v536_v0, 2 }
 0x36e   :  { %v538_v35 = vadd.f32 %v537_v34, %v536_v0 }
 0x370   :  { %v539_v36 = vrot.slane %v538_v35, 1 }
 0x372   :  { %v540_v37 = vadd.f32 %v539_v36, %v538_v35 }
 0x374   :  { %v541_v38 = vmul.f32 0.14285715, %v540_v37 }
 0x376   :  { %778 = vrsqrt.f32 %v541_v38  ;;  %vm544_vm4 = vcmp.eq.f32.partialorder %v541_v38, inf  ;;  %v547_v56 = vand.u32 2147483648, %v541_v38  ;;  %vm546_vm5 = vcmp.eq.f32.partialorder %v541_v38, 0.0 }
 0x380   :  { %v779_v39 = vpop.eup %778 }
 0x381   :  { %v543_v40 = vmul.f32 %v779_v39, %v541_v38 }
 0x383   :  { %v545_v57 = vsel %vm544_vm4, %v541_v38, %v543_v40 }
 0x384   :  { %v548_v58 = vsel %vm546_vm5, %v547_v56, %v545_v57 }
 0x385   :  { %v549_v41 = vmax.f32 %v548_v58, 1e-12 }
 0x387   :  { %780 = vrcp.f32 %v549_v41  ;;  %v551_v42 = vsub.f32 %v532_v30, %v549_v41  ;;  %v558_v44 = vsub.f32 %v525_v15, %v549_v41  ;;  %v552_v52 = vadd.f32 %v549_v41, %v532_v30 }
 0x389   :  { %v553_v43 = vsub.f32 %v551_v42, %v525_v15  ;;  %v559_v48 = vsub.f32 %v558_v44, %v532_v30  ;;  %vm564_vm6 = vcmp.gt.f32.partialorder %v525_v15, %v552_v52  ;;  %vm563_vm7 = vcmp.lt.f32.partialorder %v525_v15, %v551_v42 }
 0x391   :  { %v781_v45 = vpop.eup %780 }
 0x392   :  { %v554_v46 = vmul.f32 %v781_v45, %v553_v43  ;;  %v560_v50 = vmul.f32 %v781_v45, %v559_v48 }
 0x394   :  { %v555_v47 = vmul.f32 4.0, %v554_v46  ;;  %v561_v51 = vmul.f32 4.0, %v560_v50 }
 0x396   :  { %v556_v49 = vadd.f32 1.0, %v555_v47  ;;  %v562_v53 = vadd.f32 1.0, %v561_v51 }
 0x398   :  { %782 = vrcp.f32 %v556_v49  ;;  %v565_v55 = vsel %vm564_vm6, %v562_v53, 1.0 }
 0x3a2   :  { %v783_v54 = vpop.eup %782 }
 0x3a3   :  { %v566_v60 = vsel %vm563_vm7, %v783_v54, %v565_v55 }
 0x3a4   :  { %v567_v61 = vmax.f32 %v566_v60, 0.1 }
 0x3a6   :  { %v568_v62 = vmin.f32 %v567_v61, 10.0 }
 0x3a8   :  { %569 = vst [vmem:[#allocation13] sm:$0xff] %v568_v62 }
 0x3a9   :  { %883 = shalt.err (!%p880_p8)
}
 0x3aa   :  { %s884_s15 = scalar_lea.hbm %s1225_s12, 128 }
 0x3ab   :  { %p885_p9 = scmp.ne.s32.totalorder %s1225_s12, %s884_s15  ;;  %p888_p10 = scmp.lt.u32.totalorder %s884_s15, %s1225_s12 }
 0x3ad   :  { %p890_p11 = pnand %p888_p10, %p885_p9 }
 0x3af   :  { %893 = shalt.err (!%p890_p11)
}
 0x3b0   :  { %594 = dma.vmem_to_hbm [thread:$0]  %s592_s27, 128, %s1225_s12, [#allocation14]  }
 0x3b1   :  { %s894_s4 = scalar_lea.vmem %s582_s30, 128  ;;  %p899_p13 = scmp.lt.s32.totalorder %s582_s30, %s582_s30 }
 0x3b2   :  { %p895_p12 = scmp.ne.s32.totalorder %s582_s30, %s894_s4  ;;  %p900_p0 = scmp.lt.s32.totalorder %s894_s4, %s894_s4 }
 0x3b4   :  { %p901_p1 = por %p900_p0, %p899_p13 }
 0x3b6   :  { %p902_p2 = pnand %p901_p1, %p895_p12 }
 0x3b8   :  { %905 = shalt.err (!%p902_p2)
}
 0x3b9   :  { %s906_s23 = scalar_lea.hbm %s1224_s11, 128 }
 0x3ba   :  { %p907_p3 = scmp.ne.s32.totalorder %s1224_s11, %s906_s23  ;;  %p910_p4 = scmp.lt.u32.totalorder %s906_s23, %s1224_s11 }
 0x3bc   :  { %p912_p5 = pnand %p910_p4, %p907_p3 }
 0x3be   :  { %915 = shalt.err (!%p912_p5)
}
 0x3bf   :  { %584 = dma.vmem_to_hbm [thread:$0]  %s582_s30, 128, %s1224_s11, [#allocation6]   ;;  %vm571_vm8 = vcmp.eq.s32.totalorder %v1084_v4, 1  ;;  %vm570_vm9 = vcmp.eq.s32.totalorder %v1084_v4, 0 }
 0x3c0   :  { %s959_s28 = smov [#allocation15]  }
 0x3c1   :  { %s601_s25 = sshll.u32 %s959_s28, 4  ;;  %s602_s25 = int_to_ptr.vmem [resolvable:$true] %s601_s25 }
 0x3c2   :  { %s916_s11 = scalar_lea.vmem %s602_s25, 16  ;;  %s920_s5 = scalar_lea.vmem %s602_s25, 32 }
 0x3c3   :  { %p917_p6 = scmp.ne.s32.totalorder %s602_s25, %s916_s11  ;;  %p921_p7 = scmp.lt.s32.totalorder %s602_s25, %s602_s25 }
 0x3c4   :  { %p922_p8 = scmp.lt.s32.totalorder %s920_s5, %s916_s11 }
 0x3c6   :  { %p923_p9 = por %p922_p8, %p921_p7 }
 0x3c8   :  { %p924_p10 = pnand %p923_p9, %p917_p6 }
 0x3ea   :  { %v465_v63 = vpop.xlane.xlu1 %464 }
 0x3eb   :  { %v466_v1 = vrot.slane %v465_v63, 4 }
 0x3ed   :  { %v467_v2 = vadd.f32 %v466_v1, %v465_v63 }
 0x3ee   :  { %v446_v8 = vpop.xlane.xlu1 %445 }
 0x3ef   :  { %v468_v3 = vrot.slane %v467_v2, 2  ;;  %v447_v9 = vsub.f32 0.0, %v446_v8 }
 0x3f1   :  { %v469_v5 = vadd.f32 %v468_v3, %v467_v2  ;;  %v475_v12 = vmul.f32 0.1, %v447_v9 }
 0x3f2   :  { %v493_v13 = vpop.xlane.xlu1 %492 }
 0x3f3   :  { %v470_v6 = vrot.slane %v469_v5, 1  ;;  %v572_v16 = vsel %vm571_vm8, %v493_v13, 0.0 }
 0x3f5   :  { %v471_v7 = vadd.f32 %v470_v6, %v469_v5 }
 0x3f7   :  { %727 = vpush %v471_v7 }
 0x428   :  { %s728_s8 = spop %727 }
 0x429   :  { %v473_v10 = vstv %s728_s8 }
 0x42a   :  { %v474_v14 = vmul.f32 0.125, %v473_v10 }
 0x42c   :  { %v476_v15 = vadd.f32 %v475_v12, %v474_v14 }
 0x42e   :  { %v573_v28 = vsel %vm570_vm9, %v476_v15, %v572_v16 }
 0x42f   :  { %574 = vst [vmem:[#allocation15] sm:$0x1] %v573_v28 }
 0x430   :  { %927 = shalt.err (!%p924_p10)
}
 0x431   :  { %s928_s27 = scalar_lea.hbm %s1226_s13, 16 }
 0x432   :  { %p929_p11 = scmp.ne.s32.totalorder %s1226_s13, %s928_s27  ;;  %p932_p12 = scmp.lt.u32.totalorder %s928_s27, %s1226_s13 }
 0x434   :  { %p934_p13 = pnand %p932_p12, %p929_p11 }
 0x436   :  { %937 = shalt.err (!%p934_p13)
}
 0x437   :  { %604 = dma.vmem_to_hbm [thread:$0]  %s602_s25, 16, %s1226_s13, [#allocation14]  }
 0x438   :  { %944 = dma.done.wait [#allocation6], 128  }
 0x439   :  { %945 = vsyncadd [#allocation6], 4294967168 }
 0x43a   :  { %946 = dma.done.wait [#allocation14], 144  }
 0x43b   :  { %947 = vsyncadd [#allocation14], 4294967152 }
 0x43c   :  { %614 = vsyncpa [#allocation5], 1 }
 0x43d   :  { %615 = vsyncpa [#allocation8], 1 }
 0x43e   :  { %616 = vsyncpa [#allocation11], 1 }
 0x43f   :  { %617 = vsyncpa [#allocation6], 1 }
 0x440   :  { %618 = vsyncpa [#allocation14], 1 }

</bundles_post_ra>
